<compile_context>
chip_gen: v6e
topology: v6e:2x2x1
jax: 0.10.0
libtpu: 0.0.40
codegen_flags: <defaults>
</compile_context>

<pallas_src>
import math

import jax
import jax.numpy as jnp
from jax import lax
from jax.experimental import pallas as pl
from jax.experimental.pallas import tpu as pltpu


def _linear_kernel(x_ref, w_ref, o_ref, acc_ref):
    # Grid = (M/tm, N/tn, K/tk); K (reduction) is the last, "arbitrary" axis.
    @pl.when(pl.program_id(2) == 0)
    def _():
        acc_ref[...] = jnp.zeros_like(acc_ref)

    # x block: (tm, tk), w block: (tn, tk)  ->  (tm, tn), contracting dim 1 of both.
    acc_ref[...] += lax.dot_general(
        x_ref[...],
        w_ref[...],
        dimension_numbers=(((1,), (1,)), ((), ())),
        preferred_element_type=jnp.float32,
    )

    @pl.when(pl.program_id(2) == pl.num_programs(2) - 1)
    def _():
        o_ref[...] = acc_ref[...].astype(o_ref.dtype)


def _round_up(x: int, m: int) -> int:
    return ((x + m - 1) // m) * m


def _choose_tile(dim: int, preferred: int, gran: int) -> int:
    """Largest tile <= preferred that is a multiple of `gran`, biased toward
    the choice that minimizes padding of `dim` (never exceeds VMEM via a
    silent full-extent fallback)."""
    dim_r = _round_up(dim, gran)
    if dim_r <= preferred:
        return dim_r
    best_t, best_pad = gran, _round_up(dim_r, gran)
    t = preferred
    while t >= gran:
        pad = _round_up(dim_r, t)
        if pad < best_pad:
            best_t, best_pad = t, pad
        t -= gran
    return best_t


def linear_forward(
    x: jax.Array,
    weight: jax.Array,
    *,
    tm: int = 512,
    tn: int = 512,
    tk: int = 1024,
    compute_dtype=None,
) -> jax.Array:
    """y[..., d_out] = sum_k x[..., k] * weight[d_out, k]."""
    *lead, d_in = x.shape
    d_out, d_in_w = weight.shape
    assert d_in == d_in_w
    M = int(math.prod(lead)) if lead else 1
    out_dtype = x.dtype

    x2d = x.reshape(M, d_in)
    w = weight
    if compute_dtype is not None:
        x2d = x2d.astype(compute_dtype)
        w = w.astype(compute_dtype)
    cdtype = x2d.dtype

    # Sublane granularity for the M axis: 8 for 32-bit, 16 for packed dtypes.
    m_gran = 8 if jnp.dtype(cdtype).itemsize >= 4 else 16

    tm = _choose_tile(M, tm, m_gran)
    tn = _choose_tile(d_out, tn, 128)   # lane-dense output: tn always >= 128
    tk = _choose_tile(d_in, tk, 128)

    Mp = _round_up(M, tm)
    Np = _round_up(d_out, tn)
    Kp = _round_up(d_in, tk)

    # v7x megacore: try to expose >= 2 parallel blocks so both TCs get work.
    if (Mp // tm) * (Np // tn) < 2:
        if tm >= 2 * m_gran:
            tm = _round_up(tm // 2, m_gran)
            Mp = _round_up(M, tm)
        elif tn >= 256 and (tn // 2) % 128 == 0:
            tn = tn // 2
            Np = _round_up(d_out, tn)

    # Zero-pad to tile multiples (zeros contribute nothing to the contraction).
    if (Mp, Kp) != (M, d_in):
        x2d = jnp.pad(x2d, ((0, Mp - M), (0, Kp - d_in)))
    if (Np, Kp) != (d_out, d_in):
        w = jnp.pad(w, ((0, Np - d_out), (0, Kp - d_in)))

    grid = (Mp // tm, Np // tn, Kp // tk)

    # VMEM budget: double-buffered inputs + double-buffered output + f32 acc.
    bytes_in = jnp.dtype(cdtype).itemsize
    bytes_out = jnp.dtype(out_dtype).itemsize
    vmem_est = (
        2 * (tm * tk + tn * tk) * bytes_in
        + 2 * tm * tn * bytes_out
        + tm * tn * 4
    )
    vmem_limit = int(min(64 * 1024 * 1024, max(32 * 1024 * 1024, 1.5 * vmem_est)))

    y2d = pl.pallas_call(
        _linear_kernel,
        out_shape=jax.ShapeDtypeStruct((Mp, Np), out_dtype),
        grid_spec=pltpu.PrefetchScalarGridSpec(
            num_scalar_prefetch=0,
            grid=grid,
            in_specs=[
                pl.BlockSpec((tm, tk), lambda i, j, k: (i, k)),   # x[M, K]
                pl.BlockSpec((tn, tk), lambda i, j, k: (j, k)),   # w[N, K] (native layout)
            ],
            out_specs=pl.BlockSpec((tm, tn), lambda i, j, k: (i, j)),
            scratch_shapes=[pltpu.VMEM((tm, tn), jnp.float32)],
        ),
        compiler_params=pltpu.CompilerParams(
            dimension_semantics=("parallel", "parallel", "arbitrary"),
            vmem_limit_bytes=vmem_limit,
        ),
    )(x2d, w)

    if (Mp, Np) != (M, d_out):
        y2d = y2d[:M, :d_out]
    return y2d.reshape(*lead, d_out)


def init_linear_weight(key, in_features: int, out_features: int,
                       dtype=jnp.float32) -> jax.Array:
    # Faithful to the reference module: trunc_normal_(mean=0, std=sigma**2,
    # a=-3*sigma, b=3*sigma) with sigma = sqrt(2 / (in + out)).
    # (Yes, the spec uses sigma**2 as the std — we reproduce it exactly.)
    sigma = (2.0 / (in_features + out_features)) ** 0.5
    std = sigma ** 2
    lo = (-3.0 * sigma) / std
    hi = (3.0 * sigma) / std
    w = jax.random.truncated_normal(
        key, lo, hi, (out_features, in_features), dtype=jnp.float32
    ) * std
    return w.astype(dtype)


if __name__ == "__main__":
    key = jax.random.PRNGKey(0)
    kx, kw = jax.random.split(key)

    batch, seq, d_in, d_out = 2, 8, 32, 64
    x = jax.random.normal(kx, (batch, seq, d_in), dtype=jnp.float32)
    weight = init_linear_weight(kw, d_in, d_out, dtype=jnp.float32)

    y_ref = jnp.einsum("bsi,oi->bso", x, weight)

    # f32 compute path (exact semantics of the module).
    y = linear_forward(x, weight)
    jax.block_until_ready(y)
    assert y.shape == (batch, seq, d_out)
    assert jnp.allclose(y, y_ref, atol=1e-5, rtol=1e-5)

    # bf16-fed MXU path with f32 accumulation (perf option; looser tolerance).
    y_bf16 = linear_forward(x, weight, compute_dtype=jnp.bfloat16)
    jax.block_until_ready(y_bf16)
    assert y_bf16.shape == (batch, seq, d_out)
    assert jnp.allclose(y_bf16, y_ref, atol=1e-2, rtol=2e-2)

    print("KERNEL_OK")
</pallas_src>

<mosaic_0001>
module attributes {stable_mosaic.version = 11 : i64} {
  func.func @_linear_kernel(%arg0: i32, %arg1: i32, %arg2: i32, %arg3: memref<8x128xf32, #tpu.memory_space<vmem>>, %arg4: memref<128x128xf32, #tpu.memory_space<vmem>>, %arg5: memref<8x128xf32, #tpu.memory_space<vmem>>, %arg6: memref<8x128xf32, #tpu.memory_space<vmem>>) attributes {dimension_semantics = [#tpu.dimension_semantics<parallel>, #tpu.dimension_semantics<parallel>, #tpu.dimension_semantics<arbitrary>], iteration_bounds = array<i64: 2, 1, 1>, scalar_prefetch = 0 : i64, scratch_operands = 1 : i64, tpu.core_type = #tpu.core_type<tc>, window_params = [{transform_indices = @transform_0, window_bounds = array<i64: 8, 128>}, {transform_indices = @transform_1, window_bounds = array<i64: 128, 128>}, {transform_indices = @transform_2, window_bounds = array<i64: 8, 128>}]} {
    %c0_i32 = arith.constant 0 : i32
    %0 = arith.cmpi eq, %arg2, %c0_i32 : i32
    %1 = arith.extui %0 : i1 to i32
    %c0_i32_0 = arith.constant 0 : i32
    %2 = arith.cmpi ne, %1, %c0_i32_0 : i32
    scf.if %2 {
      %cst_10 = arith.constant 0.000000e+00 : f32
      %12 = vector.broadcast %cst_10 : f32 to vector<8x128xf32>
      %c0_11 = arith.constant 0 : index
      %c0_12 = arith.constant 0 : index
      %13 = vector.load %arg6[%c0_11, %c0_12] : memref<8x128xf32, #tpu.memory_space<vmem>>, vector<8x128xf32>
      tpu.vector_store %arg6[%c0_11, %c0_12], %12 {strides = array<i32>} : memref<8x128xf32, #tpu.memory_space<vmem>>, vector<8x128xf32>,
    } else {
    }
    %c0 = arith.constant 0 : index
    %c0_1 = arith.constant 0 : index
    %3 = vector.load %arg6[%c0, %c0_1] : memref<8x128xf32, #tpu.memory_space<vmem>>, vector<8x128xf32>
    %c0_2 = arith.constant 0 : index
    %c0_3 = arith.constant 0 : index
    %4 = vector.load %arg3[%c0_2, %c0_3] : memref<8x128xf32, #tpu.memory_space<vmem>>, vector<8x128xf32>
    %c0_4 = arith.constant 0 : index
    %c0_5 = arith.constant 0 : index
    %5 = vector.load %arg4[%c0_4, %c0_5] : memref<128x128xf32, #tpu.memory_space<vmem>>, vector<128x128xf32>
    %cst = arith.constant dense<0.000000e+00> : vector<8x128xf32>
    %6 = tpu.matmul %4, %5, %cst {dimension_numbers = #tpu.dot_dimension_numbers<[1], [1], [0], [0], [0, 0, 1, 0], [], []>} : vector<8x128xf32>, vector<128x128xf32>, vector<8x128xf32> -> vector<8x128xf32>
    %7 = arith.addf %3, %6 : vector<8x128xf32>
    %c0_6 = arith.constant 0 : index
    %c0_7 = arith.constant 0 : index
    %8 = vector.load %arg6[%c0_6, %c0_7] : memref<8x128xf32, #tpu.memory_space<vmem>>, vector<8x128xf32>
    tpu.vector_store %arg6[%c0_6, %c0_7], %7 {strides = array<i32>} : memref<8x128xf32, #tpu.memory_space<vmem>>, vector<8x128xf32>,
    %c0_i32_8 = arith.constant 0 : i32
    %9 = arith.cmpi eq, %arg2, %c0_i32_8 : i32
    %10 = arith.extui %9 : i1 to i32
    %c0_i32_9 = arith.constant 0 : i32
    %11 = arith.cmpi ne, %10, %c0_i32_9 : i32
    scf.if %11 {
      %c0_10 = arith.constant 0 : index
      %c0_11 = arith.constant 0 : index
      %12 = vector.load %arg6[%c0_10, %c0_11] : memref<8x128xf32, #tpu.memory_space<vmem>>, vector<8x128xf32>
      %c0_12 = arith.constant 0 : index
      %c0_13 = arith.constant 0 : index
      %13 = vector.load %arg5[%c0_12, %c0_13] : memref<8x128xf32, #tpu.memory_space<vmem>>, vector<8x128xf32>
      tpu.vector_store %arg5[%c0_12, %c0_13], %12 {strides = array<i32>} : memref<8x128xf32, #tpu.memory_space<vmem>>, vector<8x128xf32>,
    } else {
    }
    return
  }
  func.func @transform_0(%arg0: i32, %arg1: i32, %arg2: i32) -> (i32, i32) {
    %c0_i32 = arith.constant 0 : i32
    return %arg0, %arg2 : i32, i32
  }
  func.func @transform_1(%arg0: i32, %arg1: i32, %arg2: i32) -> (i32, i32) {
    %c0_i32 = arith.constant 0 : i32
    return %arg1, %arg2 : i32, i32
  }
  func.func @transform_2(%arg0: i32, %arg1: i32, %arg2: i32) -> (i32, i32) {
    %c0_i32 = arith.constant 0 : i32
    return %arg0, %arg1 : i32, i32
  }
}

</mosaic_0001>

<bundles_post_ra>
// kernel: tpu_custom_call.1
= control target key start
LH: loop header
LB: loop body
LE: loop exit
PB: predicated region body
PF: predicated region fallthrough
CT: control target
= control target key end

     0   :  { %7 = vsyncpa [#allocation4], 0  ;;  %s914_s0 = inlined_call_operand.hbm [shape: f32[16,128], index: 0, kind: input, shape index: {}]   ;;  %s915_s1 = inlined_call_operand.hbm [shape: f32[128,128], index: 1, kind: input, shape index: {}]   ;;  %s916_s2 = inlined_call_operand.hbm [shape: f32[16,128], index: 2, kind: output, shape index: {}]  }
   0x1   :  { %9 = vsyncpa [#allocation4 + $0x1], 0 }
   0x2   :  { %10 = vsyncpa [#allocation7], 0 }
   0x3   :  { %11 = vsyncpa [#allocation5], 0 }
   0x4   :  { %13 = vsyncpa [#allocation5 + $0x1], 0  ;;  %s728_s9 = smov 0   ;;  %s730_s10 = smov 0  }
   0x5   :  { %s732_s11 = smov 0   ;;  %s734_s12 = smov 0  }
   0x6   :  { %s736_s13 = smov 0   ;;  %s738_s14 = smov 0  }
   0x7 LB: > { %s422_s15 = sadd.s32 4294967295, %s704_s14   ;;  %s423_s16 = sadd.s32 4294967294, %s704_s14   ;;  %s704_s14 = sphi %s738_s14, %s19_s14   ;;  %s700_s13 = sphi %s736_s13, %s934_s13   ;;  %s696_s12 = sphi %s734_s12, %s933_s12   ;;  %s692_s11 = sphi %s732_s11, %s932_s11   ;;  %s688_s10 = sphi %s730_s10, %s931_s10   ;;  %s684_s9 = sphi %s728_s9, %s930_s9  }
   0x8   : > { %p60_p0 = scmp.ne.s32.totalorder %s688_s10, %s684_s9  ;;  %p762_p1 = scmp.eq.s32.totalorder %s422_s15, 0 }
   0x9   : > { %p766_p2 = scmp.eq.s32.totalorder %s422_s15, 1  ;;  %p120_p3 = scmp.eq.s32.totalorder %s423_s16, 1 }
   0xa   : > { %p772_p4 = por %p762_p1, %p60_p0  ;;  %p424_p5 = scmp.ge.s32.totalorder %s704_s14, 1 }
   0xb   : > { %p777_p6 = por %p120_p3, %p60_p0  ;;  %p127_p7 = scmp.lt.s32.totalorder %s704_s14, 3 }
   0xc   : > { %s920_s19 = scalar_select %p772_p4, 1, 0 }
   0xd   : > { %s921_s20 = scalar_select %p777_p6, 1, 0 }
   0xe   : > { %p782_p8 = pnand %p424_p5, %p127_p7  ;;  %s706_s22 = smov [#allocation6]  }
   0xf   : > { %s143_s23 = sshll.u32 %s706_s22, 4  ;;  %s38_s25 = sadd.s32 1, %s700_s13  ;;  %s144_s23 = int_to_ptr.vmem [resolvable:$true] %s143_s23 }
  0x10   : > { %p497_p9 = pneg %p782_p8  ;;  %s577_s26 = scalar_lea.vmem %s144_s23, 2048 }
  0x11   : > { %p578_p13 = scmp.ne.s32.totalorder %s144_s23, %s577_s26  ;;  %p585_p5 = scmp.lt.s32.totalorder %s144_s23, %s144_s23 }
  0x12   : > { %p791_p11 = pnand %p497_p9, %p762_p1  ;;  %p586_p7 = scmp.lt.s32.totalorder %s577_s26, %s577_s26 }
  0x14   : > { %p568_p12 = pneg %p791_p11  ;;  %p587_p6 = por %p586_p7, %p585_p5 }
  0x16   : > { %p580_p0 = pnand %p578_p13, %p568_p12 }
  0x18   : > { %p581_p3 = pneg %p580_p0 }
  0x1a   : > { %p588_p4 = pnand %p587_p6, %p581_p3 }
  0x1c   : > { %591 = shalt.err (!%p588_p4)
}
  0x1d   : > { %s707_s27 = smov 128   ;;  %s708_s28 = smov 8  }
  0x1e   : > { %500 = dma.hbm_to_vmem [thread:$0]  (!%p791_p11), %s915_s1, 2048, %s144_s23, [#allocation7], %s707_s27, %s707_s27, %s708_s28  }
  0x1f   : > { %p40_p6 = scmp.ge.s32.totalorder %s38_s25, 2  ;;  %s47_s3 = sadd.s32 1, %s692_s11 }
  0x20   : > { %p54_p4 = scmp.ne.s32.totalorder %s692_s11, %s688_s10  ;;  %p55_p9 = scmp.eq.s32.totalorder %s704_s14, 0 }
  0x21   : > { %s936_s25 = smov (%p40_p6, %s38_s25), 0  ;;  %p510_p0 = scmp.lt.s32.totalorder %s704_s14, 2 }
  0x22   : > { %p809_p12 = por %p55_p9, %p54_p4  ;;  %p815_p13 = por %p766_p2, %p54_p4 }
  0x23   : > { %s42_s6 = ssub.s32 %s700_s13, %s936_s25  ;;  %s157_s7 = sand.u32 1, %s692_s11  }
  0x24   : > { %p45_p11 = scmp.eq.s32.totalorder %s42_s6, 0  ;;  %s427_s8 = sshll.u32 %s157_s7, 3 }
  0x25   : > { %s428_s16 = sshll.u32 %s700_s13, 7  ;;  %s161_s26 = scalar_lea.vmem [#allocation3], %s427_s8 }
  0x26   : > { %s824_s15 = scalar_select %p45_p11, %s692_s11, %s47_s3  }
  0x27   : > { %s167_s24 = scalar_lea.hbm %s914_s0, %s428_s16  ;;  %s169_s27 = sshll.u32 %s161_s26, 4  ;;  %s170_s27 = int_to_ptr.vmem [resolvable:$true] %s169_s27 }
  0x28   : > { %p832_p2 = pnand %p510_p0, %p809_p12  ;;  %s158_s28 = scalar_lea.sflag [#allocation4], %s157_s7 }
  0x29   : > { %s605_s29 = scalar_lea.vmem %s170_s27, 128  ;;  %s709_s30 = smov [#allocation3]  }
  0x2a   : > { %p594_p3 = pneg %p832_p2  ;;  %p606_p5 = scmp.ne.s32.totalorder %s170_s27, %s605_s29 }
  0x2b   : > { %s610_s3 = sshll.u32 %s709_s30, 4  ;;  %s611_s3 = int_to_ptr.vmem [resolvable:$false] %s610_s3 }
  0x2c   : > { %p608_p7 = pnand %p606_p5, %p594_p3  ;;  %s612_s6 = scalar_lea.vmem %s611_s3, 256 }
  0x2d   : > { %p613_p4 = scmp.lt.s32.totalorder %s170_s27, %s611_s3  ;;  %p614_p9 = scmp.lt.s32.totalorder %s612_s6, %s605_s29 }
  0x2e   : > { %p609_p6 = pneg %p608_p7 }
  0x2f   : > { %p615_p11 = por %p614_p9, %p613_p4 }
  0x31   : > { %p616_p10 = pnand %p615_p11, %p609_p6 }
  0x33   : > { %619 = shalt.err (!%p616_p10)
}
  0x34   : > { %504 = dma.hbm_to_vmem [thread:$0]  (!%p832_p2), %s167_s24, 128, %s170_s27, %s158_s28  }
  0x35   : > { %178 = sbr.rel (%p782_p8) target bundleno = 333 (0x14d), region = 28  ;;  %s843_s4 = sand.u32 (!%p782_p8), 1, %s688_s10  }
  0x36   : > { %s430_s7 = sshll.u32 (!%p782_p8), %s843_s4, 3  ;;  %s181_s8 = scalar_lea.sflag (!%p782_p8), [#allocation4], %s843_s4 }
  0x37   : > { %s849_s16 = scalar_lea.vmem (!%p782_p8), [#allocation3], %s430_s7  ;;  %p927_p12 = scmp.ne.s32.totalorder (!%p782_p8), %s920_s19, 0 }
  0x3a   : > { %671 = dma.done.wait (%p927_p12), %s181_s8, 128  }
  0x3b   : > { %673 = vsyncadd (%p927_p12), %s181_s8, 4294967168 }
  0x3c   : > { %675 = dma.done.wait (%p762_p1), [#allocation7], 2048  }
  0x3d   : > { %677 = vsyncadd (%p762_p1), [#allocation7], 4294965248  ;;  %v710_v0 = vmov 0.0   ;;  %vm711_vm0 = vmmov 0   ;;  %v232_v1 = vld [vmem:[#allocation6 + $0x78] sm:$0xff]  ;;  %v231_v2 = vld [vmem:[#allocation6 + $0x70] sm:$0xff] }
  0x3e   : > { %454 = vmatprep.subr.mxu0 %v710_v0  ;;  %486 = vmatprep.mubr.msk.f32.mxu0 %vm711_vm0, %v710_v0  ;;  %v230_v3 = vld [vmem:[#allocation6 + $0x68] sm:$0xff]  ;;  %v229_v4 = vld [vmem:[#allocation6 + $0x60] sm:$0xff]  ;;  %v228_v5 = vld [vmem:[#allocation6 + $0x58] sm:$0xff]  ;;  %s208_s17 = scalar_lea.vmem [#allocation8], %s430_s7  ;;  %s434_s21 = sshll.u32 %s696_s12, 7 }
  0x3f   : > { %455 = vmatpush3.xpose.msra.mxu0 %v232_v1  ;;  %v227_v6 = vld [vmem:[#allocation6 + $0x50] sm:$0xff]  ;;  %v226_v7 = vld [vmem:[#allocation6 + $0x48] sm:$0xff]  ;;  %v225_v8 = vld [vmem:[#allocation6 + $0x40] sm:$0xff]  ;;  %s325_s19 = sshll.u32 %s208_s17, 4  ;;  %s868_s24 = scalar_lea.hbm %s916_s2, %s434_s21  ;;  %s863_s19 = int_to_ptr.vmem [resolvable:$true] %s325_s19 }
  0x40   : > { %456 = vmatprep.subr.mxu0 %v710_v0  ;;  %v224_v9 = vld [vmem:[#allocation6 + $0x38] sm:$0xff]  ;;  %v223_v10 = vld [vmem:[#allocation6 + $0x30] sm:$0xff]  ;;  %v222_v11 = vld [vmem:[#allocation6 + $0x28] sm:$0xff]  ;;  %s311_s26 = scalar_lea.sflag [#allocation5], %s843_s4  ;;  %s620_s27 = scalar_lea.vmem %s863_s19, 128 }
  0x41   : > { %v221_v12 = vld [vmem:[#allocation6 + $0x20] sm:$0xff]  ;;  %v220_v13 = vld [vmem:[#allocation6 + $0x18] sm:$0xff]  ;;  %v219_v14 = vld [vmem:[#allocation6 + $0x10] sm:$0xff]  ;;  %p621_p1 = scmp.ne.s32.totalorder %s863_s19, %s620_s27  ;;  %s712_s12 = smov [#allocation8]  }
  0x42   : > { %v218_v15 = vld [vmem:[#allocation6 + $0x8] sm:$0xff]  ;;  %v217_v16 = vld [vmem:[#allocation6] sm:$0xff]  ;;  %v216_v17 = vld [vmem:[%s849_s16] sm:$0xff]  ;;  %s624_s18 = sshll.u32 %s712_s12, 4  ;;  %s625_s18 = int_to_ptr.vmem [resolvable:$false] %s624_s18 }
  0x43   : > { %457 = vmatpush3.xpose.msra.mxu0 %v231_v2  ;;  %p622_p8 = pnand %p621_p1, %p815_p13  ;;  %s626_s28 = scalar_lea.vmem %s625_s18, 256 }
  0x44   : > { %458 = vmatprep.subr.mxu0 %v710_v0  ;;  %p627_p0 = scmp.lt.s32.totalorder %s863_s19, %s625_s18  ;;  %p628_p2 = scmp.lt.s32.totalorder %s626_s28, %s620_s27 }
  0x45   : > { %p623_p10 = pneg %p622_p8 }
  0x46   : > { %p629_p3 = por %p628_p2, %p627_p0 }
  0x47   : > { %459 = vmatpush3.xpose.msra.mxu0 %v230_v3 }
  0x48   : > { %460 = vmatprep.subr.mxu0 %v710_v0  ;;  %p630_p5 = pnand %p629_p3, %p623_p10 }
  0x4b   : > { %461 = vmatpush3.xpose.msra.mxu0 %v229_v4 }
  0x4c   : > { %462 = vmatprep.subr.mxu0 %v710_v0 }
  0x4f   : > { %463 = vmatpush3.xpose.msra.mxu0 %v228_v5 }
  0x50   : > { %464 = vmatprep.subr.mxu0 %v710_v0 }
  0x53   : > { %465 = vmatpush3.xpose.msra.mxu0 %v227_v6 }
  0x54   : > { %466 = vmatprep.subr.mxu0 %v710_v0 }
  0x57   : > { %467 = vmatpush3.xpose.msra.mxu0 %v226_v7 }
  0x58   : > { %468 = vmatprep.subr.mxu0 %v710_v0 }
  0x5b   : > { %469 = vmatpush3.xpose.msra.mxu0 %v225_v8 }
  0x5c   : > { %470 = vmatprep.subr.mxu0 %v710_v0 }
  0x5f   : > { %471 = vmatpush3.xpose.msra.mxu0 %v224_v9 }
  0x60   : > { %472 = vmatprep.subr.mxu0 %v710_v0 }
  0x63   : > { %473 = vmatpush3.xpose.msra.mxu0 %v223_v10 }
  0x64   : > { %474 = vmatprep.subr.mxu0 %v710_v0 }
  0x67   : > { %475 = vmatpush3.xpose.msra.mxu0 %v222_v11 }
  0x68   : > { %476 = vmatprep.subr.mxu0 %v710_v0 }
  0x6b   : > { %477 = vmatpush3.xpose.msra.mxu0 %v221_v12 }
  0x6c   : > { %478 = vmatprep.subr.mxu0 %v710_v0 }
  0x6f   : > { %479 = vmatpush3.xpose.msra.mxu0 %v220_v13 }
  0x70   : > { %480 = vmatprep.subr.mxu0 %v710_v0 }
  0x73   : > { %481 = vmatpush3.xpose.msra.mxu0 %v219_v14 }
  0x74   : > { %482 = vmatprep.subr.mxu0 %v710_v0 }
  0x77   : > { %483 = vmatpush3.xpose.msra.mxu0 %v218_v15 }
  0x78   : > { %484 = vmatprep.subr.mxu0 %v710_v0 }
  0x7b   : > { %485 = vmatpush3.xpose.msra.mxu0 %v217_v16 }
  0x7e   : > { %487 = vmatmul.mubr.f32.vlgmr.msra.gmra.mxu0 %v216_v17 }
 0x13e   : > { %v299_v18 = vpop.f32.mrf.mxu0 }
 0x13f   : > { %309 = vst [vmem:[%s208_s17] sm:$0xff] %v299_v18 }
 0x140   : > { %v488_v19 = vpop.f32.mrf.mxu0 }
 0x141   : > { %633 = shalt.err (!%p630_p5)
}
 0x142   : > { %s634_s29 = scalar_lea.hbm %s868_s24, 128  ;;  %s638_s6 = scalar_lea.hbm %s916_s2, 256 }
 0x143   : > { %p635_p7 = scmp.ne.s32.totalorder %s868_s24, %s634_s29  ;;  %p639_p9 = scmp.lt.s32.totalorder %s868_s24, %s916_s2 }
 0x144   : > { %p640_p11 = scmp.lt.s32.totalorder %s638_s6, %s634_s29 }
 0x145   : > { %p636_p6 = pnand %p635_p7, %p815_p13 }
 0x146   : > { %p641_p12 = por %p640_p11, %p639_p9 }
 0x147   : > { %p637_p4 = pneg %p636_p6 }
 0x149   : > { %p642_p1 = pnand %p641_p12, %p637_p4 }
 0x14b   : > { %645 = shalt.err (!%p642_p1)
}
 0x14c   : > { %495 = dma.vmem_to_hbm [thread:$0]  (%p815_p13), %s863_s19, 128, %s868_s24, %s311_s26  }
 0x14d PF: > { %s337_s8 = sand.u32 1, %s684_s9   ;;  %p928_p8 = scmp.ne.s32.totalorder %s921_s20, 0 }
 0x14e   : > { %p929_p10 = scmp.ge.s32.totalorder %s704_s14, 2  ;;  %s338_s16 = scalar_lea.sflag [#allocation5], %s337_s8 }
 0x150   : > { %p506_p0 = pnand %p929_p10, %p928_p8 }
 0x152   : > { %p507_p2 = pneg %p506_p0 }
 0x154   : > { %679 = dma.done.wait (%p507_p2), %s338_s16, 128  }
 0x155   : > { %681 = vsyncadd (%p507_p2), %s338_s16, 4294967168  ;;  %s19_s14 = sadd.s32 1, %s704_s14   ;;  %s930_s9 = smov %s688_s10 }
 0x156   : > { %p16_p3 = scmp.ge.s32.totalorder %s19_s14, 4   ;;  %s931_s10 = smov %s692_s11 }
 0x157   : > { %s932_s11 = smov %s824_s15  ;;  %s933_s12 = smov %s700_s13 }
 0x158   : > { %s934_s13 = smov %s936_s25  ;;  %18 = sbr.rel (!%p16_p3) target bundleno = 7 (0x7), region = 86 }
 0x15d   :  { %343 = vsyncpa [#allocation4], 1 }
 0x15e   :  { %345 = vsyncpa [#allocation4 + $0x1], 1 }
 0x15f   :  { %346 = vsyncpa [#allocation7], 1 }
 0x160   :  { %347 = vsyncpa [#allocation5], 1 }
 0x161   :  { %349 = vsyncpa [#allocation5 + $0x1], 1 }

</bundles_post_ra>
